<compile_context>
chip_gen: v6e
topology: v6e:2x2x1
jax: 0.10.0
libtpu: 0.0.40
codegen_flags: <defaults>
</compile_context>

<pallas_src>
import functools

import jax
import jax.numpy as jnp
from jax.experimental import pallas as pl
from jax.experimental.pallas import tpu as pltpu

EPS = 1e-5  # nn.InstanceNorm2d default eps


def _pick_hw_tile(total, target=2048, quantum=128):
    """Largest divisor of `total` that is a multiple of `quantum` and <= target."""
    best = quantum
    d = quantum
    while d <= min(total, target):
        if total % d == 0:
            best = d
        d += quantum
    return best


def _pick_cout_tile(c_out):
    if c_out <= 128:
        return c_out
    for cand in range(128, 7, -8):
        if c_out % cand == 0:
            return cand
    return c_out


def _conv_block_kernel(p_ref, w_ref, o_ref, sum_ref, ssq_ref, *,
                       hw_tile, hw_valid, use_act):
    # p_ref: (1, KK*C_in, hw_tile)       folded im2col tile (bf16 or f32)
    # w_ref: (co_tile, KK*C_in)          folded conv weights
    # o_ref: (1, co_tile, HW_pad)        resident across the HW-tile grid axis
    # sum_ref/ssq_ref: (co_tile, 1) f32  streamed per-channel statistics
    t = pl.program_id(2)

    @pl.when(t == 0)
    def _init():
        sum_ref[...] = jnp.zeros_like(sum_ref)
        ssq_ref[...] = jnp.zeros_like(ssq_ref)

    # Single MXU matmul over the folded (K*K*C_in) contraction, f32 accumulate.
    acc = jnp.dot(w_ref[...], p_ref[0],
                  preferred_element_type=jnp.float32)  # (co_tile, hw_tile)

    # Write the raw conv tile into the VMEM-resident output plane.
    start = pl.multiple_of(t * hw_tile, 128)
    o_ref[0, :, pl.ds(start, hw_tile)] = acc

    # Stream InstanceNorm statistics (padded lanes contribute exact zeros).
    sum_ref[...] += jnp.sum(acc, axis=-1, keepdims=True)
    ssq_ref[...] += jnp.sum(acc * acc, axis=-1, keepdims=True)

    @pl.when(t == pl.num_programs(2) - 1)
    def _finalize():
        inv_n = jnp.float32(1.0 / hw_valid)
        mean = sum_ref[...] * inv_n
        var = jnp.maximum(ssq_ref[...] * inv_n - mean * mean, 0.0)
        scale = jax.lax.rsqrt(var + EPS)
        y = (o_ref[0] - mean) * scale
        if use_act:
            y = jnp.maximum(y, 0.0)
        o_ref[0] = y


def conv_block(x, weight, bias=None, *, padding=1, use_act=True,
               compute_dtype=jnp.bfloat16):
    """x: (N, C_in, H, W) f32; weight: (C_out, C_in, K, K); bias ignored.

    The conv bias is a per-channel constant that is exactly cancelled by the
    affine-free InstanceNorm mean subtraction, so it is dropped (dead work).
    """
    del bias
    N, C_in, H, W = x.shape
    C_out, _, K, _ = weight.shape
    HW = H * W
    KKC = K * K * C_in

    # --- glue in plain JAX: reflect pad + folded im2col + weight repack ---
    x_pad = jnp.pad(
        x, ((0, 0), (0, 0), (padding, padding), (padding, padding)),
        mode="reflect")
    slabs = []
    for kh in range(K):
        for kw in range(K):
            slabs.append(
                x_pad[:, :, kh:kh + H, kw:kw + W].reshape(N, 1, C_in, HW))
    patches = jnp.concatenate(slabs, axis=1).reshape(N, KKC, HW)

    # Lane-dense output: pad HW up to a multiple of 128 with zeros.
    HW_pad = ((HW + 127) // 128) * 128
    if HW_pad != HW:
        patches = jnp.pad(patches, ((0, 0), (0, 0), (0, HW_pad - HW)))
    patches = patches.astype(compute_dtype)

    # weight[o, c, kh, kw] -> w_packed[o, (kh*K + kw)*C_in + c]
    w_packed = jnp.transpose(weight, (0, 2, 3, 1)).reshape(C_out, KKC)
    w_packed = w_packed.astype(compute_dtype)

    hw_tile = _pick_hw_tile(HW_pad)
    co_tile = _pick_cout_tile(C_out)
    n_hw = HW_pad // hw_tile
    n_co = C_out // co_tile

    itemsize = jnp.dtype(compute_dtype).itemsize
    vmem_needed = (
        2 * KKC * hw_tile * itemsize      # double-buffered patches tile
        + 2 * co_tile * KKC * itemsize    # weights block
        + 2 * co_tile * HW_pad * 4        # resident output plane (f32)
        + 2 * co_tile * 128 * 4           # stats scratch (padded)
    )
    vmem_limit = int(min(64 * 2**20, max(32 * 2**20, 2 * vmem_needed)))

    kernel = functools.partial(
        _conv_block_kernel, hw_tile=hw_tile, hw_valid=HW, use_act=use_act)

    out_flat = pl.pallas_call(
        kernel,
        out_shape=jax.ShapeDtypeStruct((N, C_out, HW_pad), jnp.float32),
        grid_spec=pltpu.PrefetchScalarGridSpec(
            num_scalar_prefetch=0,
            grid=(N, n_co, n_hw),
            in_specs=[
                pl.BlockSpec((1, KKC, hw_tile), lambda n, co, t: (n, 0, t)),
                pl.BlockSpec((co_tile, KKC), lambda n, co, t: (co, 0)),
            ],
            out_specs=pl.BlockSpec((1, co_tile, HW_pad),
                                   lambda n, co, t: (n, co, 0)),
            scratch_shapes=[
                pltpu.VMEM((co_tile, 1), jnp.float32),
                pltpu.VMEM((co_tile, 1), jnp.float32),
            ],
        ),
        compiler_params=pltpu.CompilerParams(
            dimension_semantics=("parallel", "parallel", "arbitrary"),
            vmem_limit_bytes=vmem_limit,
        ),
    )(patches, w_packed)

    return out_flat[:, :, :HW].reshape(N, C_out, H, W)


def _reference(x, weight, bias, *, padding=1, use_act=True):
    """Pure-JAX reference matching PyTorch semantics (bias included)."""
    C_out = weight.shape[0]
    x_pad = jnp.pad(
        x, ((0, 0), (0, 0), (padding, padding), (padding, padding)),
        mode="reflect")
    y = jax.lax.conv_general_dilated(
        x_pad, weight, window_strides=(1, 1), padding="VALID",
        dimension_numbers=("NCHW", "OIHW", "NCHW"),
    ) + bias.reshape(1, C_out, 1, 1)
    mean = jnp.mean(y, axis=(2, 3), keepdims=True)
    var = jnp.mean((y - mean) ** 2, axis=(2, 3), keepdims=True)
    y = (y - mean) * jax.lax.rsqrt(var + EPS)
    if use_act:
        y = jnp.maximum(y, 0.0)
    return y


if __name__ == "__main__":
    # Small deterministic shapes consistent with ConvBlock(kernel_size=3,
    # stride=1, padding=1): batch=2, in_channels=4, out_channels=8, 16x16.
    N, C_in, C_out, H, W, K = 2, 4, 8, 16, 16, 3

    key = jax.random.PRNGKey(0)
    kx, kw, kb = jax.random.split(key, 3)
    x = jax.random.normal(kx, (N, C_in, H, W), dtype=jnp.float32)
    weight = jax.random.normal(kw, (C_out, C_in, K, K), dtype=jnp.float32) * 0.1
    bias = jax.random.normal(kb, (C_out,), dtype=jnp.float32) * 0.1

    ref = jax.block_until_ready(
        _reference(x, weight, bias, padding=1, use_act=True))

    # Exact-path check (f32 matmul) against the PyTorch-faithful reference.
    out_f32 = jax.block_until_ready(
        conv_block(x, weight, bias, padding=1, use_act=True,
                   compute_dtype=jnp.float32))
    assert out_f32.shape == (N, C_out, H, W)
    assert jnp.max(jnp.abs(out_f32 - ref)) < 1e-4, "f32 path mismatch vs reference"

    # Fast-path check (bf16 MXU operands, f32 accumulation / norm).
    out_bf16 = jax.block_until_ready(
        conv_block(x, weight, bias, padding=1, use_act=True,
                   compute_dtype=jnp.bfloat16))
    assert out_bf16.shape == (N, C_out, H, W)
    assert jnp.max(jnp.abs(out_bf16 - ref)) < 5e-2, "bf16 path mismatch vs reference"

    print("KERNEL_OK")
</pallas_src>

<mosaic_0001>
module attributes {stable_mosaic.version = 11 : i64} {
  func.func @_conv_block_kernel(%arg0: i32, %arg1: i32, %arg2: i32, %arg3: memref<1x36x256xf32, #tpu.memory_space<vmem>>, %arg4: memref<8x36xf32, #tpu.memory_space<vmem>>, %arg5: memref<1x8x256xf32, #tpu.memory_space<vmem>>, %arg6: memref<8x1xf32, #tpu.memory_space<vmem>>, %arg7: memref<8x1xf32, #tpu.memory_space<vmem>>) attributes {dimension_semantics = [#tpu.dimension_semantics<parallel>, #tpu.dimension_semantics<parallel>, #tpu.dimension_semantics<arbitrary>], iteration_bounds = array<i64: 2, 1, 1>, scalar_prefetch = 0 : i64, scratch_operands = 2 : i64, tpu.core_type = #tpu.core_type<tc>, window_params = [{transform_indices = @transform_0, window_bounds = array<i64: 1, 36, 256>}, {transform_indices = @transform_1, window_bounds = array<i64: 8, 36>}, {transform_indices = @transform_2, window_bounds = array<i64: 1, 8, 256>}]} {
    %c0_i32 = arith.constant 0 : i32
    %0 = arith.cmpi eq, %arg2, %c0_i32 : i32
    %1 = arith.extui %0 : i1 to i32
    %c0_i32_0 = arith.constant 0 : i32
    %2 = arith.cmpi ne, %1, %c0_i32_0 : i32
    scf.if %2 {
      %cst_19 = arith.constant 0.000000e+00 : f32
      %27 = vector.broadcast %cst_19 : f32 to vector<8x1xf32>
      %c0_20 = arith.constant 0 : index
      %c0_21 = arith.constant 0 : index
      %28 = vector.load %arg6[%c0_20, %c0_21] : memref<8x1xf32, #tpu.memory_space<vmem>>, vector<8x1xf32>
      tpu.vector_store %arg6[%c0_20, %c0_21], %27 {strides = array<i32>} : memref<8x1xf32, #tpu.memory_space<vmem>>, vector<8x1xf32>,
      %cst_22 = arith.constant 0.000000e+00 : f32
      %29 = vector.broadcast %cst_22 : f32 to vector<8x1xf32>
      %c0_23 = arith.constant 0 : index
      %c0_24 = arith.constant 0 : index
      %30 = vector.load %arg7[%c0_23, %c0_24] : memref<8x1xf32, #tpu.memory_space<vmem>>, vector<8x1xf32>
      tpu.vector_store %arg7[%c0_23, %c0_24], %29 {strides = array<i32>} : memref<8x1xf32, #tpu.memory_space<vmem>>, vector<8x1xf32>,
    } else {
    }
    %c0 = arith.constant 0 : index
    %c0_1 = arith.constant 0 : index
    %3 = vector.load %arg4[%c0, %c0_1] : memref<8x36xf32, #tpu.memory_space<vmem>>, vector<8x36xf32>
    %c0_2 = arith.constant 0 : index
    %c0_3 = arith.constant 0 : index
    %c0_4 = arith.constant 0 : index
    %4 = vector.load %arg3[%c0_2, %c0_3, %c0_4] : memref<1x36x256xf32, #tpu.memory_space<vmem>>, vector<1x36x256xf32>
    %5 = vector.shape_cast %4 : vector<1x36x256xf32> to vector<36x256xf32>
    %cst = arith.constant dense<0.000000e+00> : vector<8x256xf32>
    %6 = tpu.matmul %3, %5, %cst {dimension_numbers = #tpu.dot_dimension_numbers<[1], [0], [0], [1], [0, 0, 1, 1], [], []>} : vector<8x36xf32>, vector<36x256xf32>, vector<8x256xf32> -> vector<8x256xf32>
    %c256_i32 = arith.constant 256 : i32
    %7 = arith.muli %arg2, %c256_i32 : i32
    %8 = tpu.assume_multiple %7, 128 : i32
    %c0_5 = arith.constant 0 : index
    %c0_6 = arith.constant 0 : index
    %9 = arith.index_cast %8 : i32 to index
    %10 = vector.load %arg5[%c0_5, %c0_6, %9] : memref<1x8x256xf32, #tpu.memory_space<vmem>>, vector<1x8x256xf32>
    %11 = vector.shape_cast %10 : vector<1x8x256xf32> to vector<8x256xf32>
    %12 = vector.shape_cast %6 : vector<8x256xf32> to vector<1x8x256xf32>
    tpu.vector_store %arg5[%c0_5, %c0_6, %9], %12 {strides = array<i32>} : memref<1x8x256xf32, #tpu.memory_space<vmem>>, vector<1x8x256xf32>,
    %c0_7 = arith.constant 0 : index
    %c0_8 = arith.constant 0 : index
    %13 = vector.load %arg6[%c0_7, %c0_8] : memref<8x1xf32, #tpu.memory_space<vmem>>, vector<8x1xf32>
    %cst_9 = arith.constant dense<0.000000e+00> : vector<8xf32>
    %14 = vector.multi_reduction <add>, %6, %cst_9 [1] : vector<8x256xf32> to vector<8xf32>
    %15 = vector.shape_cast %14 : vector<8xf32> to vector<8x1xf32>
    %16 = arith.addf %13, %15 : vector<8x1xf32>
    %c0_10 = arith.constant 0 : index
    %c0_11 = arith.constant 0 : index
    %17 = vector.load %arg6[%c0_10, %c0_11] : memref<8x1xf32, #tpu.memory_space<vmem>>, vector<8x1xf32>
    tpu.vector_store %arg6[%c0_10, %c0_11], %16 {strides = array<i32>} : memref<8x1xf32, #tpu.memory_space<vmem>>, vector<8x1xf32>,
    %c0_12 = arith.constant 0 : index
    %c0_13 = arith.constant 0 : index
    %18 = vector.load %arg7[%c0_12, %c0_13] : memref<8x1xf32, #tpu.memory_space<vmem>>, vector<8x1xf32>
    %19 = arith.mulf %6, %6 : vector<8x256xf32>
    %cst_14 = arith.constant dense<0.000000e+00> : vector<8xf32>
    %20 = vector.multi_reduction <add>, %19, %cst_14 [1] : vector<8x256xf32> to vector<8xf32>
    %21 = vector.shape_cast %20 : vector<8xf32> to vector<8x1xf32>
    %22 = arith.addf %18, %21 : vector<8x1xf32>
    %c0_15 = arith.constant 0 : index
    %c0_16 = arith.constant 0 : index
    %23 = vector.load %arg7[%c0_15, %c0_16] : memref<8x1xf32, #tpu.memory_space<vmem>>, vector<8x1xf32>
    tpu.vector_store %arg7[%c0_15, %c0_16], %22 {strides = array<i32>} : memref<8x1xf32, #tpu.memory_space<vmem>>, vector<8x1xf32>,
    %c0_i32_17 = arith.constant 0 : i32
    %24 = arith.cmpi eq, %arg2, %c0_i32_17 : i32
    %25 = arith.extui %24 : i1 to i32
    %c0_i32_18 = arith.constant 0 : i32
    %26 = arith.cmpi ne, %25, %c0_i32_18 : i32
    scf.if %26 {
      %c0_19 = arith.constant 0 : index
      %c0_20 = arith.constant 0 : index
      %27 = vector.load %arg6[%c0_19, %c0_20] : memref<8x1xf32, #tpu.memory_space<vmem>>, vector<8x1xf32>
      %cst_21 = arith.constant 3.906250e-03 : f32
      %28 = vector.broadcast %cst_21 : f32 to vector<8x1xf32>
      %29 = arith.mulf %27, %28 : vector<8x1xf32>
      %c0_22 = arith.constant 0 : index
      %c0_23 = arith.constant 0 : index
      %30 = vector.load %arg7[%c0_22, %c0_23] : memref<8x1xf32, #tpu.memory_space<vmem>>, vector<8x1xf32>
      %cst_24 = arith.constant 3.906250e-03 : f32
      %31 = vector.broadcast %cst_24 : f32 to vector<8x1xf32>
      %32 = arith.mulf %30, %31 : vector<8x1xf32>
      %33 = arith.mulf %29, %29 : vector<8x1xf32>
      %34 = arith.subf %32, %33 : vector<8x1xf32>
      %cst_25 = arith.constant 0.000000e+00 : f32
      %35 = vector.broadcast %cst_25 : f32 to vector<8x1xf32>
      %36 = arith.maximumf %34, %35 : vector<8x1xf32>
      %cst_26 = arith.constant 9.99999974E-6 : f32
      %37 = vector.broadcast %cst_26 : f32 to vector<8x1xf32>
      %38 = arith.addf %36, %37 : vector<8x1xf32>
      %39 = math.rsqrt %38 : vector<8x1xf32>
      %c0_27 = arith.constant 0 : index
      %c0_28 = arith.constant 0 : index
      %c0_29 = arith.constant 0 : index
      %40 = vector.load %arg5[%c0_27, %c0_28, %c0_29] : memref<1x8x256xf32, #tpu.memory_space<vmem>>, vector<1x8x256xf32>
      %41 = vector.shape_cast %40 : vector<1x8x256xf32> to vector<8x256xf32>
      %42 = vector.broadcast %29 : vector<8x1xf32> to vector<8x256xf32>
      %43 = arith.subf %41, %42 : vector<8x256xf32>
      %44 = vector.broadcast %39 : vector<8x1xf32> to vector<8x256xf32>
      %45 = arith.mulf %43, %44 : vector<8x256xf32>
      %cst_30 = arith.constant 0.000000e+00 : f32
      %46 = vector.broadcast %cst_30 : f32 to vector<8x256xf32>
      %47 = arith.maximumf %45, %46 : vector<8x256xf32>
      %c0_31 = arith.constant 0 : index
      %c0_32 = arith.constant 0 : index
      %c0_33 = arith.constant 0 : index
      %48 = vector.load %arg5[%c0_31, %c0_32, %c0_33] : memref<1x8x256xf32, #tpu.memory_space<vmem>>, vector<1x8x256xf32>
      %49 = vector.shape_cast %48 : vector<1x8x256xf32> to vector<8x256xf32>
      %50 = vector.shape_cast %47 : vector<8x256xf32> to vector<1x8x256xf32>
      tpu.vector_store %arg5[%c0_31, %c0_32, %c0_33], %50 {strides = array<i32>} : memref<1x8x256xf32, #tpu.memory_space<vmem>>, vector<1x8x256xf32>,
    } else {
    }
    return
  }
  func.func @transform_0(%arg0: i32, %arg1: i32, %arg2: i32) -> (i32, i32, i32) {
    %c0_i32 = arith.constant 0 : i32
    %c0_i32_0 = arith.constant 0 : i32
    return %arg0, %c0_i32, %arg2 : i32, i32, i32
  }
  func.func @transform_1(%arg0: i32, %arg1: i32, %arg2: i32) -> (i32, i32) {
    %c0_i32 = arith.constant 0 : i32
    %c0_i32_0 = arith.constant 0 : i32
    return %arg1, %c0_i32 : i32, i32
  }
  func.func @transform_2(%arg0: i32, %arg1: i32, %arg2: i32) -> (i32, i32, i32) {
    %c0_i32 = arith.constant 0 : i32
    %c0_i32_0 = arith.constant 0 : i32
    return %arg0, %arg1, %c0_i32 : i32, i32, i32
  }
}

</mosaic_0001>

<bundles_post_ra>
// kernel: tpu_custom_call.1
= control target key start
LH: loop header
LB: loop body
LE: loop exit
PB: predicated region body
PF: predicated region fallthrough
CT: control target
= control target key end

     0   :  { %7 = vsyncpa [#allocation5], 0  ;;  %s750_s0 = inlined_call_operand.vmem [shape: f32[2,36,256], index: 0, kind: input, shape index: {}]   ;;  %s751_s1 = inlined_call_operand.vmem [shape: f32[8,36], index: 1, kind: input, shape index: {}]   ;;  %s752_s2 = inlined_call_operand.hbm [shape: f32[2,8,256], index: 2, kind: output, shape index: {}]  }
   0x1   :  { %9 = vsyncpa [#allocation5 + $0x1], 0  ;;  %s638_s9 = smov 0   ;;  %s640_s10 = smov 0  }
   0x2   :  { %s642_s11 = smov 0   ;;  %s644_s12 = smov 0  }
   0x3   :  { %s646_s13 = smov 0   ;;  %s648_s14 = smov 0  }
   0x4 LB: > { %s463_s15 = sadd.s32 4294967295, %s618_s14   ;;  %s464_s16 = sadd.s32 4294967294, %s618_s14   ;;  %s618_s14 = sphi %s648_s14, %s15_s14   ;;  %s614_s13 = sphi %s646_s13, %s759_s13   ;;  %s610_s12 = sphi %s644_s12, %s758_s12   ;;  %s606_s11 = sphi %s642_s11, %s757_s11   ;;  %s602_s10 = sphi %s640_s10, %s756_s10   ;;  %s598_s9 = sphi %s638_s9, %s755_s9  }
   0x5   : > { %s34_s17 = sadd.s32 1, %s614_s13  ;;  %s97_s18 = sadd.s32 1, %s606_s11 }
   0x6   : > { %p36_p0 = scmp.ge.s32.totalorder %s34_s17, 2  ;;  %p107_p1 = scmp.ne.s32.totalorder %s606_s11, %s602_s10 }
   0x7   : > { %p108_p2 = scmp.eq.s32.totalorder %s463_s15, 1  ;;  %p113_p3 = scmp.ne.s32.totalorder %s602_s10, %s598_s9 }
   0x8   : > { %s761_s17 = smov (%p36_p0, %s34_s17), 0  ;;  %p114_p5 = scmp.eq.s32.totalorder %s464_s16, 1 }
   0x9   : > { %p678_p4 = por %p108_p2, %p107_p1  ;;  %s92_s20 = ssub.s32 %s614_s13, %s761_s17 }
   0xa   : > { %p468_p6 = scmp.ge.s32.totalorder %s618_s14, 1  ;;  %p95_p7 = scmp.eq.s32.totalorder %s92_s20, 0 }
   0xb   : > { %p685_p8 = por %p114_p5, %p113_p3  ;;  %p152_p9 = scmp.lt.s32.totalorder %s618_s14, 3 }
   0xc   : > { %s691_s22 = scalar_select %p95_p7, %s606_s11, %s97_s18  }
   0xd   : > { %p153_p10 = pnand %p468_p6, %p152_p9 }
   0xe   : > { %p183_p11 = scmp.lt.s32.totalorder (!%p153_p10), %s610_s12, 1  ;;  %s179_s30 = sand.u32 (!%p153_p10), 1, %s602_s10  }
   0xf   : > { %156 = sbr.rel (%p153_p10) target bundleno = 548 (0x224), region = 28  ;;  %s469_s3 = sshll.u32 (!%p153_p10), %s179_s30, 4 }
  0x10   : > { %s479_s4 = sshll.u32 (!%p153_p10), %s610_s12, 8  ;;  %s181_s5 = scalar_lea.vmem (!%p153_p10), [#allocation4], %s469_s3 }
  0x11   : > { %s367_s6 = sshll.u32 (!%p153_p10), %s181_s5, 4  ;;  %s710_s15 = scalar_lea.hbm (!%p153_p10), %s752_s2, %s479_s4  ;;  %s368_s6 = int_to_ptr.vmem [resolvable:$true] %s367_s6 }
  0x12   : > { %s351_s16 = scalar_lea.sflag (!%p153_p10), [#allocation5], %s179_s30  ;;  %s542_s18 = scalar_lea.vmem (!%p153_p10), %s368_s6, 256 }
  0x13   : > { %p543_p12 = scmp.ne.s32.totalorder (!%p153_p10), %s368_s6, %s542_s18 }
  0x14   : > { %vm200_vm0 = vcmask 7168   ;;  %v620_v0 = vmov 0.0   ;;  %s184_s23 = scalar_select %p183_p11, %s610_s12, 1  ;;  %vm218_vm1 = vcmask 1043456   ;;  %v203_v11 = vld [vmem:[%s751_s1] sm:$0xff]  ;;  %vm214_vm2 = vcmask 293888  }
  0x15   : > { %201 = vst.msk [vmem:[#allocation2] sm:$0xff] %vm200_vm0, %v620_v0  ;;  %202 = vst.msk [vmem:[#allocation3] sm:$0xff] %vm200_vm0, %v620_v0  ;;  %289 = vmatprep.mubr.f32.mxu0 %v620_v0  ;;  %v621_v18 = vmov 0   ;;  %p544_p13 = pnand %p543_p12, %p678_p4  ;;  %s622_s12 = smov [#allocation4]  }
  0x16   : > { %s480_s24 = smul.u32 80, %s184_s23  ;;  %538 = vset.pattern.permute.xlu1 %v621_v18  ;;  %539 = vset.pattern.permute.xlu0 %v621_v18  ;;  %s546_s20 = sshll.u32 %s622_s12, 4  ;;  %s547_s20 = int_to_ptr.vmem [resolvable:$false] %s546_s20 }
  0x17   : > { %p545_p0 = pneg %p544_p13  ;;  %s548_s23 = scalar_lea.vmem %s547_s20, 512 }
  0x18   : > { %s190_s27 = scalar_lea.vmem %s750_s0, %s480_s24  ;;  %p549_p1 = scmp.lt.s32.totalorder %s368_s6, %s547_s20 }
  0x19   : > { %v213_v1 = vld [vmem:[%s190_s27 + $0x48] sm:$0xf]  ;;  %v212_v2 = vld [vmem:[%s190_s27 + $0x40] sm:$0xf]  ;;  %v211_v3 = vld [vmem:[%s190_s27 + $0x38] sm:$0xff]  ;;  %p550_p2 = scmp.lt.s32.totalorder %s548_s23, %s542_s18 }
  0x1a   : > { %471 = vmatprep.subr.msk.mxu0 %vm218_vm1, %v213_v1  ;;  %v210_v4 = vld [vmem:[%s190_s27 + $0x30] sm:$0xff]  ;;  %v209_v5 = vld [vmem:[%s190_s27 + $0x28] sm:$0xff]  ;;  %v208_v6 = vld [vmem:[%s190_s27 + $0x20] sm:$0xff] }
  0x1b   : > { %472 = vmatpush1.msk.msra.mxu0 %vm218_vm1, %v212_v2  ;;  %v207_v7 = vld [vmem:[%s190_s27 + $0x18] sm:$0xff]  ;;  %v206_v8 = vld [vmem:[%s190_s27 + $0x10] sm:$0xff]  ;;  %v205_v9 = vld [vmem:[%s190_s27 + $0x8] sm:$0xff]  ;;  %p551_p3 = por %p550_p2, %p549_p1 }
  0x1c   : > { %249 = vmatprep.subr.mxu0 %v211_v3  ;;  %v204_v10 = vld [vmem:[%s190_s27] sm:$0xff]  ;;  %v310_v22 = vld [vmem:[#allocation3] sm:$0xff] }
  0x1d   : > { %250 = vmatpush1.msra.mxu0 %v210_v4  ;;  %v303_v19 = vld [vmem:[#allocation2] sm:$0xff]  ;;  %p552_p5 = pnand %p551_p3, %p545_p0 }
  0x1e   : > { %251 = vmatprep.subr.mxu0 %v209_v5 }
  0x1f   : > { %252 = vmatpush1.msra.mxu0 %v208_v6 }
  0x20   : > { %253 = vmatprep.subr.mxu0 %v207_v7 }
  0x21   : > { %254 = vmatpush1.msra.mxu0 %v206_v8 }
  0x22   : > { %255 = vmatprep.subr.mxu0 %v205_v9 }
  0x23   : > { %256 = vmatpush1.msra.mxu0 %v204_v10 }
  0x24   : > { %473 = vmatmul.mubr.msk.f32.vlgmr.msra.gmra.mxu0 %vm214_vm2, %v203_v11 }
  0xe4   : > { %v291_v12 = vpop.f32.mrf.mxu0 }
  0xe5   : > { %v311_v16 = vmul.f32 %v291_v12, %v291_v12 }
  0xe6   : > { %v293_v13 = vpop.f32.mrf.mxu0 }
  0xe7   : > { %v312_v14 = vmul.f32 %v293_v13, %v293_v13  ;;  %v304_v15 = vadd.f32 %v293_v13, %v291_v12 }
  0xe9   : > { %305 = vadd.xlane.f32.xlu0 %v304_v15  ;;  %v313_v17 = vadd.f32 %v312_v14, %v311_v16 }
  0xed   : > { %314 = vadd.xlane.f32.xlu0 %v313_v17 }
 0x172   : > { %v306_v20 = vpop.xlane.xlu0 %305 }
 0x173   : > { %v307_v21 = vadd.f32 %v306_v20, %v303_v19 }
 0x175   : > { %309 = vst.msk [vmem:[#allocation2] sm:$0xff] %vm200_vm0, %v307_v21 }
 0x176   : > { %v315_v23 = vpop.xlane.xlu0 %314 }
 0x177   : > { %v316_v24 = vadd.f32 %v315_v23, %v310_v22 }
 0x179   : > { %317 = vst.msk [vmem:[#allocation3] sm:$0xff] %vm200_vm0, %v316_v24 }
 0x17c   : > { %v321_v25 = vld [vmem:[#allocation2] sm:$0xff] }
 0x17d   : > { %v322_v26 = vmul.f32 0.00390625, %v321_v25 }
 0x17f   : > { %334 = vperm.xlu1 %538, %v322_v26   ;;  %v325_v29 = vmul.f32 %v322_v26, %v322_v26 }
 0x180   : > { %v323_v27 = vld [vmem:[#allocation3] sm:$0xff] }
 0x181   : > { %v324_v28 = vmul.f32 0.00390625, %v323_v27 }
 0x183   : > { %v326_v30 = vsub.f32 %v324_v28, %v325_v29 }
 0x185   : > { %v327_v31 = vmax.f32 %v326_v30, 0.0 }
 0x187   : > { %v328_v32 = vadd.f32 1e-05, %v327_v31 }
 0x189   : > { %540 = vrsqrt.f32 %v328_v32 }
 0x196   : > { %v541_v33 = vpop.eup %540 }
 0x197   : > { %341 = vperm.xlu1 %538, %v541_v33  }
 0x1fa   : > { %v335_v34 = vpop.permute.xlu1 %334 }
 0x1fb   : > { %v337_v35 = vsub.f32 %v291_v12, %v335_v34  ;;  %v338_v36 = vsub.f32 %v293_v13, %v335_v34 }
 0x212   : > { %v342_v37 = vpop.permute.xlu1 %341 }
 0x213   : > { %v344_v38 = vmul.f32 %v342_v37, %v337_v35  ;;  %v345_v39 = vmul.f32 %v342_v37, %v338_v36 }
 0x215   : > { %v346_v40 = vmax.f32 %v344_v38, 0.0  ;;  %v347_v41 = vmax.f32 %v345_v39, 0.0 }
 0x217   : > { %348 = vst [vmem:[%s181_s5] sm:$0xff] %v346_v40  ;;  %349 = vst [vmem:[%s181_s5 + $0x8] sm:$0xff] %v347_v41 }
 0x218   : > { %555 = shalt.err (!%p552_p5)
}
 0x219   : > { %s556_s24 = scalar_lea.hbm %s710_s15, 256  ;;  %s560_s27 = scalar_lea.hbm %s752_s2, 512 }
 0x21a   : > { %p557_p6 = scmp.ne.s32.totalorder %s710_s15, %s556_s24  ;;  %p561_p10 = scmp.lt.s32.totalorder %s710_s15, %s752_s2 }
 0x21b   : > { %p562_p11 = scmp.lt.s32.totalorder %s560_s27, %s556_s24 }
 0x21c   : > { %p558_p7 = pnand %p557_p6, %p678_p4 }
 0x21d   : > { %p563_p12 = por %p562_p11, %p561_p10 }
 0x21e   : > { %p559_p9 = pneg %p558_p7 }
 0x220   : > { %p564_p13 = pnand %p563_p12, %p559_p9 }
 0x222   : > { %567 = shalt.err (!%p564_p13)
}
 0x223   : > { %481 = dma.vmem_to_hbm [thread:$0]  (%p678_p4), %s368_s6, 256, %s710_s15, %s351_s16  }
 0x224 PF: > { %p487_p0 = scmp.ge.s32.totalorder %s618_s14, 2  ;;  %s379_s30 = sand.u32 1, %s598_s9  }
 0x225   : > { %s380_s3 = scalar_lea.sflag [#allocation5], %s379_s30 }
 0x226   : > { %p484_p1 = pnand %p487_p0, %p685_p8 }
 0x228   : > { %p485_p2 = pneg %p484_p1 }
 0x22a   : > { %593 = dma.done.wait (%p485_p2), %s380_s3, 256  }
 0x22b   : > { %595 = vsyncadd (%p485_p2), %s380_s3, 4294967040  ;;  %s15_s14 = sadd.s32 1, %s618_s14   ;;  %s755_s9 = smov %s602_s10 }
 0x22c   : > { %p12_p3 = scmp.ge.s32.totalorder %s15_s14, 4   ;;  %s756_s10 = smov %s606_s11 }
 0x22d   : > { %s757_s11 = smov %s691_s22  ;;  %s758_s12 = smov %s614_s13 }
 0x22e   : > { %s759_s13 = smov %s761_s17  ;;  %14 = sbr.rel (!%p12_p3) target bundleno = 4 (0x4), region = 75 }
 0x233   :  { %385 = vsyncpa [#allocation5], 1 }
 0x234   :  { %387 = vsyncpa [#allocation5 + $0x1], 1 }

</bundles_post_ra>
